<compile_context>
chip_gen: v7x
topology: tpu7x:2x2x1
jax: 0.10.0
libtpu: 0.0.40
codegen_flags: <defaults>
</compile_context>

<pallas_src>
import functools

import jax
import jax.numpy as jnp
from jax.experimental import pallas as pl
from jax.experimental.pallas import tpu as pltpu

LANE = 128  # TPU lane width; everything is padded to this


def _hedger_kernel(x_ref, w_ref, b_ref, out_ref, *, action_size):
    """Whole forward pass for one batch tile; weights resident in VMEM.

    x_ref:   (bt, 128) f32   input, features zero-padded 25 -> 128
    w_ref:   (7, 128, 128)   folded+padded weights (f32 or bf16)
    b_ref:   (7, 1, 128) f32 folded+padded biases
    out_ref: (bt, 128) f32   cols [0:A)=log_pi, [A]=tanh(v), rest=0
    """
    f32 = jnp.float32
    mm_dtype = w_ref.dtype
    n_layers = w_ref.shape[0]

    h = x_ref[...]
    # 6 x (Linear + folded-BN + ReLU); dropout(training=False) == identity.
    for i in range(n_layers - 1):
        z = jnp.dot(h.astype(mm_dtype), w_ref[i], preferred_element_type=f32)
        h = jnp.maximum(z + b_ref[i], 0.0)

    # Fused pi/v head: one lane-dense matmul, cols [0:A)=fc3, [A]=fc4, rest pad.
    head = jnp.dot(h.astype(mm_dtype), w_ref[n_layers - 1],
                   preferred_element_type=f32) + b_ref[n_layers - 1]

    bt, lanes = head.shape
    col = jax.lax.broadcasted_iota(jnp.int32, (bt, lanes), 1)
    is_pi = col < action_size
    is_v = col == action_size

    # log_softmax over the pi columns only (mask v + padding out of max/sum).
    neg = jnp.float32(-1e30)
    pi = jnp.where(is_pi, head, neg)
    m = jnp.max(pi, axis=1, keepdims=True)
    z = pi - m
    lse = jnp.log(jnp.sum(jnp.exp(z), axis=1, keepdims=True))
    logp = z - lse

    v = jnp.tanh(head)

    out_ref[...] = jnp.where(is_pi, logp,
                             jnp.where(is_v, v, 0.0)).astype(out_ref.dtype)


def _prepare_packed_params(params, matmul_dtype):
    """Fold BN into Linear, fuse pi/v heads, zero-pad to 128 lanes, pack slabs."""
    eps = 1e-5

    def fold(w, b, bn):
        gamma, beta, mean, var = bn
        scale = gamma / jnp.sqrt(var + eps)
        shift = beta - mean * scale
        return w * scale[None, :], b * scale + shift

    layer_specs = [("lin1", "bn1"), ("lin2", "bn2"), ("lin3", "bn3"),
                   ("lin4", "bn4"), ("fc1", "fc_bn1"), ("fc2", "fc_bn2")]
    ws, bs = [], []
    for lin, bn in layer_specs:
        w_f, b_f = fold(params[f"{lin}_w"], params[f"{lin}_b"], params[bn])
        ws.append(w_f)
        bs.append(b_f)

    # Fused head: concat fc3 (C, A) and fc4 (C, 1) -> (C, A+1); rest is zero pad.
    ws.append(jnp.concatenate([params["fc3_w"], params["fc4_w"]], axis=1))
    bs.append(jnp.concatenate([params["fc3_b"], params["fc4_b"]], axis=0))

    def pad_w(w):
        return jnp.zeros((LANE, LANE), jnp.float32).at[:w.shape[0], :w.shape[1]].set(w)

    def pad_b(b):
        return jnp.zeros((LANE,), jnp.float32).at[:b.shape[0]].set(b)

    w_slab = jnp.stack([pad_w(w) for w in ws]).astype(matmul_dtype)        # (7,128,128)
    b_slab = jnp.stack([pad_b(b) for b in bs]).reshape(len(bs), 1, LANE)   # (7,1,128) f32
    return w_slab, b_slab


@functools.partial(jax.jit, static_argnames=("action_size", "use_bf16", "block_b"))
def hedger_forward(x, params, action_size, use_bf16=False, block_b=512):
    """Fused HedgerNNet forward.

    x: (B, 25) float32
    returns: (log_pi (B, action_size), v (B, 1))
    """
    matmul_dtype = jnp.bfloat16 if use_bf16 else jnp.float32
    w_slab, b_slab = _prepare_packed_params(params, matmul_dtype)
    n_layers = w_slab.shape[0]

    B, f_in = x.shape
    # Batch tile: sublane-aligned, capped at block_b for large batches.
    bt = max(8, min(block_b, pl.cdiv(B, 8) * 8))
    b_pad = pl.cdiv(B, bt) * bt

    x_pad = jnp.zeros((b_pad, LANE), jnp.float32).at[:B, :f_in].set(
        x.astype(jnp.float32))

    kernel = functools.partial(_hedger_kernel, action_size=action_size)
    out = pl.pallas_call(
        kernel,
        out_shape=jax.ShapeDtypeStruct((b_pad, LANE), jnp.float32),
        grid=(b_pad // bt,),
        in_specs=[
            pl.BlockSpec((bt, LANE), lambda i: (i, 0)),                    # x tile
            pl.BlockSpec((n_layers, LANE, LANE), lambda i: (0, 0, 0)),     # weights (resident)
            pl.BlockSpec((n_layers, 1, LANE), lambda i: (0, 0, 0)),        # biases  (resident)
        ],
        out_specs=pl.BlockSpec((bt, LANE), lambda i: (i, 0)),
        compiler_params=pltpu.CompilerParams(
            dimension_semantics=("parallel",)),
    )(x_pad, w_slab, b_slab)

    logp = out[:B, :action_size]
    v = out[:B, action_size:action_size + 1]
    return logp, v


def init_params(key, num_channels, action_size):
    """Deterministic synthetic parameter init mirroring the nn.Module shapes."""
    C = num_channels
    names_shapes = {
        "lin1_w": (25, C), "lin1_b": (C,),
        "lin2_w": (C, C), "lin2_b": (C,),
        "lin3_w": (C, C), "lin3_b": (C,),
        "lin4_w": (C, C), "lin4_b": (C,),
        "fc1_w": (C, C), "fc1_b": (C,),
        "fc2_w": (C, C), "fc2_b": (C,),
        "fc3_w": (C, action_size), "fc3_b": (action_size,),
        "fc4_w": (C, 1), "fc4_b": (1,),
    }
    params = {}
    keys = jax.random.split(key, len(names_shapes) + 6)
    for i, (name, shape) in enumerate(sorted(names_shapes.items())):
        params[name] = 0.1 * jax.random.normal(keys[i], shape, dtype=jnp.float32)
    # BatchNorm params: (gamma, beta, running_mean, running_var)
    bn_names = ["bn1", "bn2", "bn3", "bn4", "fc_bn1", "fc_bn2"]
    for j, n in enumerate(bn_names):
        k = keys[len(names_shapes) + j]
        kg, kb, km, kv = jax.random.split(k, 4)
        gamma = 1.0 + 0.1 * jax.random.normal(kg, (num_channels,), dtype=jnp.float32)
        beta = 0.1 * jax.random.normal(kb, (num_channels,), dtype=jnp.float32)
        mean = 0.1 * jax.random.normal(km, (num_channels,), dtype=jnp.float32)
        var = jax.random.uniform(kv, (num_channels,), dtype=jnp.float32,
                                 minval=0.5, maxval=1.5)
        params[n] = (gamma, beta, mean, var)
    return params


def reference_forward(x, params, action_size):
    """Pure-JAX reference (same inference-mode semantics) for sanity checking."""
    eps = 1e-5

    def bn(h, p):
        gamma, beta, mean, var = p
        return (h - mean) / jnp.sqrt(var + eps) * gamma + beta

    h = jax.nn.relu(bn(x @ params["lin1_w"] + params["lin1_b"], params["bn1"]))
    h = jax.nn.relu(bn(h @ params["lin2_w"] + params["lin2_b"], params["bn2"]))
    h = jax.nn.relu(bn(h @ params["lin3_w"] + params["lin3_b"], params["bn3"]))
    h = jax.nn.relu(bn(h @ params["lin4_w"] + params["lin4_b"], params["bn4"]))
    h = jax.nn.relu(bn(h @ params["fc1_w"] + params["fc1_b"], params["fc_bn1"]))
    h = jax.nn.relu(bn(h @ params["fc2_w"] + params["fc2_b"], params["fc_bn2"]))
    pi = h @ params["fc3_w"] + params["fc3_b"]
    v = h @ params["fc4_w"] + params["fc4_b"]
    return jax.nn.log_softmax(pi, axis=1), jnp.tanh(v)


if __name__ == "__main__":
    # NOTE: this kernel is ~13 KFLOP — if it is called repeatedly (e.g. MCTS),
    # batch the requests into one large B before calling hedger_forward; the
    # kernel time is dominated by fixed launch/DMA cost, not compute.
    B = 8               # batch
    NUM_CHANNELS = 32   # args['num_channels']
    ACTION_SIZE = 26    # game.getActionSize()

    key = jax.random.PRNGKey(0)
    kx, kp = jax.random.split(key)
    x = jax.random.normal(kx, (B, 25), dtype=jnp.float32)
    params = init_params(kp, NUM_CHANNELS, ACTION_SIZE)

    ref_logp, ref_v = reference_forward(x, params, ACTION_SIZE)

    # f32 everywhere: numerically matches the PyTorch/JAX reference tightly.
    logp, v = hedger_forward(x, params, ACTION_SIZE, use_bf16=False)
    jax.block_until_ready((logp, v))
    assert logp.shape == (B, ACTION_SIZE) and v.shape == (B, 1)
    assert jnp.allclose(logp, ref_logp, atol=1e-4, rtol=1e-4)
    assert jnp.allclose(v, ref_v, atol=1e-4, rtol=1e-4)

    # bf16 MXU operands (v6e/v7x recommendation), f32 accumulation + f32
    # elementwise: small, bounded numerical drift vs the f32 reference.
    logp_bf, v_bf = hedger_forward(x, params, ACTION_SIZE, use_bf16=True)
    jax.block_until_ready((logp_bf, v_bf))
    assert jnp.allclose(logp_bf, ref_logp, atol=2e-2, rtol=2e-2)
    assert jnp.allclose(v_bf, ref_v, atol=2e-2, rtol=2e-2)

    print("KERNEL_OK")
</pallas_src>

<mosaic_0001>
module attributes {stable_mosaic.version = 11 : i64} {
  func.func @_hedger_kernel(%arg0: i32, %arg1: memref<8x128xf32, #tpu.memory_space<vmem>>, %arg2: memref<7x128x128xf32, #tpu.memory_space<vmem>>, %arg3: memref<7x1x128xf32, #tpu.memory_space<vmem>>, %arg4: memref<8x128xf32, #tpu.memory_space<vmem>>) attributes {dimension_semantics = [#tpu.dimension_semantics<parallel>], iteration_bounds = array<i64: 1>, scalar_prefetch = 0 : i64, scratch_operands = 0 : i64, tpu.core_type = #tpu.core_type<tc>, window_params = [{transform_indices = @transform_0, window_bounds = array<i64: 8, 128>}, {pipeline_mode = #tpu.pipeline_mode<synchronous>, transform_indices = @transform_1, window_bounds = array<i64: 7, 128, 128>}, {pipeline_mode = #tpu.pipeline_mode<synchronous>, transform_indices = @transform_2, window_bounds = array<i64: 7, 1, 128>}, {transform_indices = @transform_3, window_bounds = array<i64: 8, 128>}]} {
    %c0 = arith.constant 0 : index
    %c0_0 = arith.constant 0 : index
    %0 = vector.load %arg1[%c0, %c0_0] : memref<8x128xf32, #tpu.memory_space<vmem>>, vector<8x128xf32>
    %c0_1 = arith.constant 0 : index
    %c0_2 = arith.constant 0 : index
    %c0_3 = arith.constant 0 : index
    %1 = vector.load %arg2[%c0_1, %c0_2, %c0_3] : memref<7x128x128xf32, #tpu.memory_space<vmem>>, vector<1x128x128xf32>
    %2 = vector.shape_cast %1 : vector<1x128x128xf32> to vector<128x128xf32>
    %cst = arith.constant dense<0.000000e+00> : vector<8x128xf32>
    %3 = tpu.matmul %0, %2, %cst {dimension_numbers = #tpu.dot_dimension_numbers<[1], [0], [0], [1], [0, 0, 1, 1], [], []>} : vector<8x128xf32>, vector<128x128xf32>, vector<8x128xf32> -> vector<8x128xf32>
    %c0_4 = arith.constant 0 : index
    %c0_5 = arith.constant 0 : index
    %c0_6 = arith.constant 0 : index
    %4 = vector.load %arg3[%c0_4, %c0_5, %c0_6] : memref<7x1x128xf32, #tpu.memory_space<vmem>>, vector<1x1x128xf32>
    %5 = vector.shape_cast %4 : vector<1x1x128xf32> to vector<1x128xf32>
    %6 = vector.broadcast %5 : vector<1x128xf32> to vector<8x128xf32>
    %7 = arith.addf %3, %6 : vector<8x128xf32>
    %cst_7 = arith.constant 0.000000e+00 : f32
    %8 = vector.broadcast %cst_7 : f32 to vector<8x128xf32>
    %9 = arith.maximumf %7, %8 : vector<8x128xf32>
    %c1 = arith.constant 1 : index
    %c0_8 = arith.constant 0 : index
    %c0_9 = arith.constant 0 : index
    %10 = vector.load %arg2[%c1, %c0_8, %c0_9] : memref<7x128x128xf32, #tpu.memory_space<vmem>>, vector<1x128x128xf32>
    %11 = vector.shape_cast %10 : vector<1x128x128xf32> to vector<128x128xf32>
    %cst_10 = arith.constant dense<0.000000e+00> : vector<8x128xf32>
    %12 = tpu.matmul %9, %11, %cst_10 {dimension_numbers = #tpu.dot_dimension_numbers<[1], [0], [0], [1], [0, 0, 1, 1], [], []>} : vector<8x128xf32>, vector<128x128xf32>, vector<8x128xf32> -> vector<8x128xf32>
    %c1_11 = arith.constant 1 : index
    %c0_12 = arith.constant 0 : index
    %c0_13 = arith.constant 0 : index
    %13 = vector.load %arg3[%c1_11, %c0_12, %c0_13] : memref<7x1x128xf32, #tpu.memory_space<vmem>>, vector<1x1x128xf32>
    %14 = vector.shape_cast %13 : vector<1x1x128xf32> to vector<1x128xf32>
    %15 = vector.broadcast %14 : vector<1x128xf32> to vector<8x128xf32>
    %16 = arith.addf %12, %15 : vector<8x128xf32>
    %cst_14 = arith.constant 0.000000e+00 : f32
    %17 = vector.broadcast %cst_14 : f32 to vector<8x128xf32>
    %18 = arith.maximumf %16, %17 : vector<8x128xf32>
    %c2 = arith.constant 2 : index
    %c0_15 = arith.constant 0 : index
    %c0_16 = arith.constant 0 : index
    %19 = vector.load %arg2[%c2, %c0_15, %c0_16] : memref<7x128x128xf32, #tpu.memory_space<vmem>>, vector<1x128x128xf32>
    %20 = vector.shape_cast %19 : vector<1x128x128xf32> to vector<128x128xf32>
    %cst_17 = arith.constant dense<0.000000e+00> : vector<8x128xf32>
    %21 = tpu.matmul %18, %20, %cst_17 {dimension_numbers = #tpu.dot_dimension_numbers<[1], [0], [0], [1], [0, 0, 1, 1], [], []>} : vector<8x128xf32>, vector<128x128xf32>, vector<8x128xf32> -> vector<8x128xf32>
    %c2_18 = arith.constant 2 : index
    %c0_19 = arith.constant 0 : index
    %c0_20 = arith.constant 0 : index
    %22 = vector.load %arg3[%c2_18, %c0_19, %c0_20] : memref<7x1x128xf32, #tpu.memory_space<vmem>>, vector<1x1x128xf32>
    %23 = vector.shape_cast %22 : vector<1x1x128xf32> to vector<1x128xf32>
    %24 = vector.broadcast %23 : vector<1x128xf32> to vector<8x128xf32>
    %25 = arith.addf %21, %24 : vector<8x128xf32>
    %cst_21 = arith.constant 0.000000e+00 : f32
    %26 = vector.broadcast %cst_21 : f32 to vector<8x128xf32>
    %27 = arith.maximumf %25, %26 : vector<8x128xf32>
    %c3 = arith.constant 3 : index
    %c0_22 = arith.constant 0 : index
    %c0_23 = arith.constant 0 : index
    %28 = vector.load %arg2[%c3, %c0_22, %c0_23] : memref<7x128x128xf32, #tpu.memory_space<vmem>>, vector<1x128x128xf32>
    %29 = vector.shape_cast %28 : vector<1x128x128xf32> to vector<128x128xf32>
    %cst_24 = arith.constant dense<0.000000e+00> : vector<8x128xf32>
    %30 = tpu.matmul %27, %29, %cst_24 {dimension_numbers = #tpu.dot_dimension_numbers<[1], [0], [0], [1], [0, 0, 1, 1], [], []>} : vector<8x128xf32>, vector<128x128xf32>, vector<8x128xf32> -> vector<8x128xf32>
    %c3_25 = arith.constant 3 : index
    %c0_26 = arith.constant 0 : index
    %c0_27 = arith.constant 0 : index
    %31 = vector.load %arg3[%c3_25, %c0_26, %c0_27] : memref<7x1x128xf32, #tpu.memory_space<vmem>>, vector<1x1x128xf32>
    %32 = vector.shape_cast %31 : vector<1x1x128xf32> to vector<1x128xf32>
    %33 = vector.broadcast %32 : vector<1x128xf32> to vector<8x128xf32>
    %34 = arith.addf %30, %33 : vector<8x128xf32>
    %cst_28 = arith.constant 0.000000e+00 : f32
    %35 = vector.broadcast %cst_28 : f32 to vector<8x128xf32>
    %36 = arith.maximumf %34, %35 : vector<8x128xf32>
    %c4 = arith.constant 4 : index
    %c0_29 = arith.constant 0 : index
    %c0_30 = arith.constant 0 : index
    %37 = vector.load %arg2[%c4, %c0_29, %c0_30] : memref<7x128x128xf32, #tpu.memory_space<vmem>>, vector<1x128x128xf32>
    %38 = vector.shape_cast %37 : vector<1x128x128xf32> to vector<128x128xf32>
    %cst_31 = arith.constant dense<0.000000e+00> : vector<8x128xf32>
    %39 = tpu.matmul %36, %38, %cst_31 {dimension_numbers = #tpu.dot_dimension_numbers<[1], [0], [0], [1], [0, 0, 1, 1], [], []>} : vector<8x128xf32>, vector<128x128xf32>, vector<8x128xf32> -> vector<8x128xf32>
    %c4_32 = arith.constant 4 : index
    %c0_33 = arith.constant 0 : index
    %c0_34 = arith.constant 0 : index
    %40 = vector.load %arg3[%c4_32, %c0_33, %c0_34] : memref<7x1x128xf32, #tpu.memory_space<vmem>>, vector<1x1x128xf32>
    %41 = vector.shape_cast %40 : vector<1x1x128xf32> to vector<1x128xf32>
    %42 = vector.broadcast %41 : vector<1x128xf32> to vector<8x128xf32>
    %43 = arith.addf %39, %42 : vector<8x128xf32>
    %cst_35 = arith.constant 0.000000e+00 : f32
    %44 = vector.broadcast %cst_35 : f32 to vector<8x128xf32>
    %45 = arith.maximumf %43, %44 : vector<8x128xf32>
    %c5 = arith.constant 5 : index
    %c0_36 = arith.constant 0 : index
    %c0_37 = arith.constant 0 : index
    %46 = vector.load %arg2[%c5, %c0_36, %c0_37] : memref<7x128x128xf32, #tpu.memory_space<vmem>>, vector<1x128x128xf32>
    %47 = vector.shape_cast %46 : vector<1x128x128xf32> to vector<128x128xf32>
    %cst_38 = arith.constant dense<0.000000e+00> : vector<8x128xf32>
    %48 = tpu.matmul %45, %47, %cst_38 {dimension_numbers = #tpu.dot_dimension_numbers<[1], [0], [0], [1], [0, 0, 1, 1], [], []>} : vector<8x128xf32>, vector<128x128xf32>, vector<8x128xf32> -> vector<8x128xf32>
    %c5_39 = arith.constant 5 : index
    %c0_40 = arith.constant 0 : index
    %c0_41 = arith.constant 0 : index
    %49 = vector.load %arg3[%c5_39, %c0_40, %c0_41] : memref<7x1x128xf32, #tpu.memory_space<vmem>>, vector<1x1x128xf32>
    %50 = vector.shape_cast %49 : vector<1x1x128xf32> to vector<1x128xf32>
    %51 = vector.broadcast %50 : vector<1x128xf32> to vector<8x128xf32>
    %52 = arith.addf %48, %51 : vector<8x128xf32>
    %cst_42 = arith.constant 0.000000e+00 : f32
    %53 = vector.broadcast %cst_42 : f32 to vector<8x128xf32>
    %54 = arith.maximumf %52, %53 : vector<8x128xf32>
    %c6 = arith.constant 6 : index
    %c0_43 = arith.constant 0 : index
    %c0_44 = arith.constant 0 : index
    %55 = vector.load %arg2[%c6, %c0_43, %c0_44] : memref<7x128x128xf32, #tpu.memory_space<vmem>>, vector<1x128x128xf32>
    %56 = vector.shape_cast %55 : vector<1x128x128xf32> to vector<128x128xf32>
    %cst_45 = arith.constant dense<0.000000e+00> : vector<8x128xf32>
    %57 = tpu.matmul %54, %56, %cst_45 {dimension_numbers = #tpu.dot_dimension_numbers<[1], [0], [0], [1], [0, 0, 1, 1], [], []>} : vector<8x128xf32>, vector<128x128xf32>, vector<8x128xf32> -> vector<8x128xf32>
    %c6_46 = arith.constant 6 : index
    %c0_47 = arith.constant 0 : index
    %c0_48 = arith.constant 0 : index
    %58 = vector.load %arg3[%c6_46, %c0_47, %c0_48] : memref<7x1x128xf32, #tpu.memory_space<vmem>>, vector<1x1x128xf32>
    %59 = vector.shape_cast %58 : vector<1x1x128xf32> to vector<1x128xf32>
    %60 = vector.broadcast %59 : vector<1x128xf32> to vector<8x128xf32>
    %61 = arith.addf %57, %60 : vector<8x128xf32>
    %62 = tpu.iota {dimensions = array<i32: 1>} : vector<8x128xi32>
    %c26_i32 = arith.constant 26 : i32
    %63 = vector.broadcast %c26_i32 : i32 to vector<8x128xi32>
    %64 = arith.cmpi slt, %62, %63 : vector<8x128xi32>
    %c26_i32_49 = arith.constant 26 : i32
    %65 = vector.broadcast %c26_i32_49 : i32 to vector<8x128xi32>
    %66 = arith.cmpi eq, %62, %65 : vector<8x128xi32>
    %cst_50 = arith.constant -1.000000e+30 : f32
    %67 = vector.broadcast %cst_50 : f32 to vector<8x128xf32>
    %68 = arith.select %64, %61, %67 : vector<8x128xi1>, vector<8x128xf32>
    %cst_51 = arith.constant dense<0xFF800000> : vector<8xf32>
    %69 = vector.multi_reduction <maximumf>, %68, %cst_51 [1] : vector<8x128xf32> to vector<8xf32>
    %70 = vector.shape_cast %69 : vector<8xf32> to vector<8x1xf32>
    %71 = vector.broadcast %70 : vector<8x1xf32> to vector<8x128xf32>
    %72 = arith.subf %68, %71 : vector<8x128xf32>
    %73 = math.exp %72 : vector<8x128xf32>
    %cst_52 = arith.constant dense<0.000000e+00> : vector<8xf32>
    %74 = vector.multi_reduction <add>, %73, %cst_52 [1] : vector<8x128xf32> to vector<8xf32>
    %75 = vector.shape_cast %74 : vector<8xf32> to vector<8x1xf32>
    %76 = math.log %75 : vector<8x1xf32>
    %77 = vector.broadcast %76 : vector<8x1xf32> to vector<8x128xf32>
    %78 = arith.subf %72, %77 : vector<8x128xf32>
    %79 = math.tanh %61 : vector<8x128xf32>
    %cst_53 = arith.constant 0.000000e+00 : f32
    %80 = vector.broadcast %cst_53 : f32 to vector<8x128xf32>
    %81 = arith.select %66, %79, %80 : vector<8x128xi1>, vector<8x128xf32>
    %82 = arith.select %64, %78, %81 : vector<8x128xi1>, vector<8x128xf32>
    %c0_54 = arith.constant 0 : index
    %c0_55 = arith.constant 0 : index
    %83 = vector.load %arg4[%c0_54, %c0_55] : memref<8x128xf32, #tpu.memory_space<vmem>>, vector<8x128xf32>
    tpu.vector_store %arg4[%c0_54, %c0_55], %82 {strides = array<i32>} : memref<8x128xf32, #tpu.memory_space<vmem>>, vector<8x128xf32>,
    return
  }
  func.func @transform_0(%arg0: i32) -> (i32, i32) {
    %c0_i32 = arith.constant 0 : i32
    %c0_i32_0 = arith.constant 0 : i32
    return %arg0, %c0_i32 : i32, i32
  }
  func.func @transform_1(%arg0: i32) -> (i32, i32, i32) {
    %c0_i32 = arith.constant 0 : i32
    %c0_i32_0 = arith.constant 0 : i32
    %c0_i32_1 = arith.constant 0 : i32
    %c0_i32_2 = arith.constant 0 : i32
    return %c0_i32, %c0_i32_0, %c0_i32_1 : i32, i32, i32
  }
  func.func @transform_2(%arg0: i32) -> (i32, i32, i32) {
    %c0_i32 = arith.constant 0 : i32
    %c0_i32_0 = arith.constant 0 : i32
    %c0_i32_1 = arith.constant 0 : i32
    %c0_i32_2 = arith.constant 0 : i32
    return %c0_i32, %c0_i32_0, %c0_i32_1 : i32, i32, i32
  }
  func.func @transform_3(%arg0: i32) -> (i32, i32) {
    %c0_i32 = arith.constant 0 : i32
    %c0_i32_0 = arith.constant 0 : i32
    return %arg0, %c0_i32 : i32, i32
  }
}

</mosaic_0001>

<bundles_post_ra>
// kernel: hedger_forward.1
= control target key start
LH: loop header
LB: loop body
LE: loop exit
PB: predicated region body
PF: predicated region fallthrough
CT: control target
= control target key end

     0   :  { %v1357_v0 = vmov 0.0|0.0   ;;  %vm1358_vm0 = vmmov 0   ;;  %v1359_v4 = vmov 0.0   ;;  %s1815_s1 = inlined_call_operand.vmem [shape: f32[7,128,128], index: 1, kind: input, shape index: {}]   ;;  %s1816_s0 = inlined_call_operand.vmem [shape: f32[8,128], index: 0, kind: input, shape index: {}]   ;;  %s1817_s2 = inlined_call_operand.vmem [shape: f32[7,1,128], index: 2, kind: input, shape index: {}]   ;;  %s1818_s3 = inlined_call_operand.vmem [shape: f32[8,128], index: 3, kind: output, shape index: {}]  }
   0x1   :  { %1180 = vmatprep.subr.bf16.mxu0 %v1357_v0  ;;  %v15_v1 = vld [vmem:[%s1815_s1] sm:$0xff]  ;;  %v16_v2 = vld [vmem:[%s1815_s1 + $0x8] sm:$0xff]  ;;  %v17_v3 = vld [vmem:[%s1815_s1 + $0x10] sm:$0xff]  ;;  %967 = vmatprep.mubr.msk.f32.mxu0 %vm1358_vm0, %v1359_v4 }
   0x2   :  { %v1181_v5 = vpack.c.bf16 %v16_v2, %v15_v1  ;;  %v18_v6 = vld [vmem:[%s1815_s1 + $0x18] sm:$0xff]  ;;  %1204 = vmatprep.subr.bf16.mxu1 %v1357_v0  ;;  %1002 = vmatprep.mubr.msk.f32.mxu1 %vm1358_vm0, %v1359_v4  ;;  %v19_v8 = vld [vmem:[%s1815_s1 + $0x20] sm:$0xff]  ;;  %v20_v9 = vld [vmem:[%s1815_s1 + $0x28] sm:$0xff] }
   0x3   :  { %v1184_v7 = vpack.c.bf16 %v18_v6, %v17_v3  ;;  %v708_v10 = vld [vmem:[%s1815_s1 + $0x80] sm:$0xff]  ;;  %v709_v11 = vld [vmem:[%s1815_s1 + $0x88] sm:$0xff]  ;;  %v710_v12 = vld [vmem:[%s1815_s1 + $0x90] sm:$0xff]  ;;  %v1187_v14 = vpack.c.bf16 %v20_v9, %v19_v8 }
   0x4   :  { %1182 = vmatpush3.bf16.msra.mxu0 %v1181_v5  ;;  %v711_v13 = vld [vmem:[%s1815_s1 + $0x98] sm:$0xff]  ;;  %v1205_v15 = vpack.c.bf16 %v709_v11, %v708_v10  ;;  %v21_v16 = vld [vmem:[%s1815_s1 + $0x30] sm:$0xff]  ;;  %v712_v19 = vld [vmem:[%s1815_s1 + $0xa0] sm:$0xff] }
   0x5   :  { %1183 = vmatprep.subr.bf16.mxu0 %v1357_v0  ;;  %v22_v17 = vld [vmem:[%s1815_s1 + $0x38] sm:$0xff]  ;;  %v1208_v18 = vpack.c.bf16 %v711_v13, %v710_v12  ;;  %v713_v20 = vld [vmem:[%s1815_s1 + $0xa8] sm:$0xff]  ;;  %v23_v22 = vld [vmem:[%s1815_s1 + $0x40] sm:$0xff] }
   0x6   :  { %1206 = vmatpush3.bf16.msra.mxu1 %v1205_v15  ;;  %v1190_v21 = vpack.c.bf16 %v22_v17, %v21_v16  ;;  %v24_v23 = vld [vmem:[%s1815_s1 + $0x48] sm:$0xff]  ;;  %v1211_v24 = vpack.c.bf16 %v713_v20, %v712_v19  ;;  %v714_v25 = vld [vmem:[%s1815_s1 + $0xb0] sm:$0xff]  ;;  %v715_v26 = vld [vmem:[%s1815_s1 + $0xb8] sm:$0xff] }
   0x7   :  { %1207 = vmatprep.subr.bf16.mxu1 %v1357_v0  ;;  %v1193_v27 = vpack.c.bf16 %v24_v23, %v23_v22  ;;  %v25_v28 = vld [vmem:[%s1815_s1 + $0x50] sm:$0xff]  ;;  %v26_v29 = vld [vmem:[%s1815_s1 + $0x58] sm:$0xff]  ;;  %v1214_v30 = vpack.c.bf16 %v715_v26, %v714_v25  ;;  %v716_v31 = vld [vmem:[%s1815_s1 + $0xc0] sm:$0xff] }
   0x8   :  { %1185 = vmatpush3.bf16.msra.mxu0 %v1184_v7  ;;  %v717_v32 = vld [vmem:[%s1815_s1 + $0xc8] sm:$0xff]  ;;  %v1196_v33 = vpack.c.bf16 %v26_v29, %v25_v28  ;;  %v27_v34 = vld [vmem:[%s1815_s1 + $0x60] sm:$0xff]  ;;  %v718_v37 = vld [vmem:[%s1815_s1 + $0xd0] sm:$0xff] }
   0x9   :  { %1186 = vmatprep.subr.bf16.mxu0 %v1357_v0  ;;  %v28_v35 = vld [vmem:[%s1815_s1 + $0x68] sm:$0xff]  ;;  %v1217_v36 = vpack.c.bf16 %v717_v32, %v716_v31  ;;  %v719_v38 = vld [vmem:[%s1815_s1 + $0xd8] sm:$0xff]  ;;  %v29_v40 = vld [vmem:[%s1815_s1 + $0x70] sm:$0xff] }
   0xa   :  { %1209 = vmatpush3.bf16.msra.mxu1 %v1208_v18  ;;  %v1199_v39 = vpack.c.bf16 %v28_v35, %v27_v34  ;;  %v30_v41 = vld [vmem:[%s1815_s1 + $0x78] sm:$0xff]  ;;  %v1220_v42 = vpack.c.bf16 %v719_v38, %v718_v37  ;;  %v720_v43 = vld [vmem:[%s1815_s1 + $0xe0] sm:$0xff]  ;;  %v721_v44 = vld [vmem:[%s1815_s1 + $0xe8] sm:$0xff] }
   0xb   :  { %1210 = vmatprep.subr.bf16.mxu1 %v1357_v0  ;;  %v1202_v45 = vpack.c.bf16 %v30_v41, %v29_v40  ;;  %v1223_v46 = vpack.c.bf16 %v721_v44, %v720_v43  ;;  %v14_v47 = vld [vmem:[%s1816_s0] sm:$0xff]  ;;  %v722_v48 = vld [vmem:[%s1815_s1 + $0xf0] sm:$0xff]  ;;  %v723_v49 = vld [vmem:[%s1815_s1 + $0xf8] sm:$0xff] }
   0xc   :  { %1188 = vmatpush3.bf16.msra.mxu0 %v1187_v14  ;;  %v1226_v50 = vpack.c.bf16 %v723_v49, %v722_v48  ;;  %v726_v51 = vld [vmem:[%s1815_s1 + $0x100] sm:$0xff]  ;;  %v727_v52 = vld [vmem:[%s1815_s1 + $0x108] sm:$0xff]  ;;  %v728_v53 = vld [vmem:[%s1815_s1 + $0x110] sm:$0xff] }
   0xd   :  { %1189 = vmatprep.subr.bf16.mxu0 %v1357_v0  ;;  %v1229_v54 = vpack.c.bf16 %v727_v52, %v726_v51  ;;  %v729_v55 = vld [vmem:[%s1815_s1 + $0x118] sm:$0xff]  ;;  %v730_v57 = vld [vmem:[%s1815_s1 + $0x120] sm:$0xff]  ;;  %v731_v58 = vld [vmem:[%s1815_s1 + $0x128] sm:$0xff] }
   0xe   :  { %1212 = vmatpush3.bf16.msra.mxu1 %v1211_v24  ;;  %v1232_v56 = vpack.c.bf16 %v729_v55, %v728_v53  ;;  %v1235_v59 = vpack.c.bf16 %v731_v58, %v730_v57  ;;  %v732_v60 = vld [vmem:[%s1815_s1 + $0x130] sm:$0xff]  ;;  %v733_v61 = vld [vmem:[%s1815_s1 + $0x138] sm:$0xff]  ;;  %v734_v63 = vld [vmem:[%s1815_s1 + $0x140] sm:$0xff] }
   0xf   :  { %1213 = vmatprep.subr.bf16.mxu1 %v1357_v0  ;;  %v1238_v62 = vpack.c.bf16 %v733_v61, %v732_v60  ;;  %v735_v1 = vld [vmem:[%s1815_s1 + $0x148] sm:$0xff]  ;;  %v736_v3 = vld [vmem:[%s1815_s1 + $0x150] sm:$0xff]  ;;  %v737_v5 = vld [vmem:[%s1815_s1 + $0x158] sm:$0xff] }
  0x10   :  { %1191 = vmatpush3.bf16.msra.mxu0 %v1190_v21  ;;  %v1241_v2 = vpack.c.bf16 %v735_v1, %v734_v63  ;;  %v1244_v6 = vpack.c.bf16 %v737_v5, %v736_v3  ;;  %v738_v7 = vld [vmem:[%s1815_s1 + $0x160] sm:$0xff]  ;;  %v739_v8 = vld [vmem:[%s1815_s1 + $0x168] sm:$0xff]  ;;  %v740_v15 = vld [vmem:[%s1815_s1 + $0x170] sm:$0xff] }
  0x11   :  { %1192 = vmatprep.subr.bf16.mxu0 %v1357_v0  ;;  %v1247_v9 = vpack.c.bf16 %v739_v8, %v738_v7  ;;  %v707_v10 = vld [vmem:[%s1817_s2] ss:$0 sm:$0xff]  ;;  %v741_v16 = vld [vmem:[%s1815_s1 + $0x178] sm:$0xff]  ;;  %v745_v19 = vld [vmem:[%s1815_s1 + $0x188] sm:$0xff] }
  0x12   :  { %1215 = vmatpush3.bf16.msra.mxu1 %v1214_v30  ;;  %v1250_v17 = vpack.c.bf16 %v741_v16, %v740_v15  ;;  %v744_v18 = vld [vmem:[%s1815_s1 + $0x180] sm:$0xff]  ;;  %v746_v20 = vld [vmem:[%s1815_s1 + $0x190] sm:$0xff]  ;;  %v747_v22 = vld [vmem:[%s1815_s1 + $0x198] sm:$0xff] }
  0x13   :  { %1216 = vmatprep.subr.bf16.mxu1 %v1357_v0  ;;  %v1253_v21 = vpack.c.bf16 %v745_v19, %v744_v18  ;;  %v1256_v23 = vpack.c.bf16 %v747_v22, %v746_v20  ;;  %v748_v24 = vld [vmem:[%s1815_s1 + $0x1a0] sm:$0xff]  ;;  %v749_v25 = vld [vmem:[%s1815_s1 + $0x1a8] sm:$0xff]  ;;  %v751_v28 = vld [vmem:[%s1815_s1 + $0x1b8] sm:$0xff] }
  0x14   :  { %1194 = vmatpush3.bf16.msra.mxu0 %v1193_v27  ;;  %v1259_v26 = vpack.c.bf16 %v749_v25, %v748_v24  ;;  %v750_v27 = vld [vmem:[%s1815_s1 + $0x1b0] sm:$0xff]  ;;  %v752_v30 = vld [vmem:[%s1815_s1 + $0x1c0] sm:$0xff]  ;;  %v753_v31 = vld [vmem:[%s1815_s1 + $0x1c8] sm:$0xff] }
  0x15   :  { %1195 = vmatprep.subr.bf16.mxu0 %v1357_v0  ;;  %v1262_v29 = vpack.c.bf16 %v751_v28, %v750_v27  ;;  %v1265_v32 = vpack.c.bf16 %v753_v31, %v752_v30  ;;  %v755_v34 = vld [vmem:[%s1815_s1 + $0x1d8] sm:$0xff]  ;;  %v757_v37 = vld [vmem:[%s1815_s1 + $0x1e8] sm:$0xff]  ;;  %v758_v44 = vld [vmem:[%s1815_s1 + $0x1f0] sm:$0xff] }
  0x16   :  { %1218 = vmatpush3.bf16.msra.mxu1 %v1217_v36  ;;  %v756_v36 = vld [vmem:[%s1815_s1 + $0x1e0] sm:$0xff]  ;;  %v763_v48 = vld [vmem:[%s1815_s1 + $0x208] sm:$0xff]  ;;  %v764_v49 = vld [vmem:[%s1815_s1 + $0x210] sm:$0xff] }
  0x17   :  { %1219 = vmatprep.subr.bf16.mxu1 %v1357_v0  ;;  %v1271_v38 = vpack.c.bf16 %v757_v37, %v756_v36  ;;  %v765_v51 = vld [vmem:[%s1815_s1 + $0x218] sm:$0xff]  ;;  %v766_v53 = vld [vmem:[%s1815_s1 + $0x220] sm:$0xff]  ;;  %v771_v60 = vld [vmem:[%s1815_s1 + $0x248] sm:$0xff] }
  0x18   :  { %1197 = vmatpush3.bf16.msra.mxu0 %v1196_v33  ;;  %v754_v33 = vld [vmem:[%s1815_s1 + $0x1d0] sm:$0xff]  ;;  %v1280_v52 = vpack.c.bf16 %v765_v51, %v764_v49  ;;  %v769_v57 = vld [vmem:[%s1815_s1 + $0x238] sm:$0xff]  ;;  %v775_v3 = vld [vmem:[%s1815_s1 + $0x268] sm:$0xff] }
  0x19   :  { %1198 = vmatprep.subr.bf16.mxu0 %v1357_v0  ;;  %v1268_v35 = vpack.c.bf16 %v755_v34, %v754_v33  ;;  %v773_v63 = vld [vmem:[%s1815_s1 + $0x258] sm:$0xff]  ;;  %v781_v15 = vld [vmem:[%s1815_s1 + $0x288] sm:$0xff]  ;;  %v782_v16 = vld [vmem:[%s1815_s1 + $0x290] sm:$0xff] }
  0x1a   :  { %1221 = vmatpush3.bf16.msra.mxu1 %v1220_v42  ;;  %v783_v18 = vld [vmem:[%s1815_s1 + $0x298] sm:$0xff]  ;;  %v784_v20 = vld [vmem:[%s1815_s1 + $0x2a0] sm:$0xff]  ;;  %v789_v27 = vld [vmem:[%s1815_s1 + $0x2c8] sm:$0xff] }
  0x1b   :  { %1222 = vmatprep.subr.bf16.mxu1 %v1357_v0  ;;  %v1304_v19 = vpack.c.bf16 %v783_v18, %v782_v16  ;;  %v787_v24 = vld [vmem:[%s1815_s1 + $0x2b8] sm:$0xff]  ;;  %v793_v33 = vld [vmem:[%s1815_s1 + $0x2e8] sm:$0xff]  ;;  %v804_v51 = vld [vmem:[%s1815_s1 + $0x330] sm:$0xff] }
  0x1c   :  { %1200 = vmatpush3.bf16.msra.mxu0 %v1199_v39  ;;  %v725_v39 = vld [vmem:[%s1817_s2 + $0x1] ss:$0 sm:$0xff]  ;;  %v791_v30 = vld [vmem:[%s1815_s1 + $0x2d8] sm:$0xff]  ;;  %v803_v49 = vld [vmem:[%s1815_s1 + $0x328] sm:$0xff] }
  0x1d   :  { %1201 = vmatprep.subr.bf16.mxu0 %v1357_v0 }
  0x1e   :  { %1224 = vmatpush3.bf16.msra.mxu1 %v1223_v46 }
  0x1f   :  { %1225 = vmatprep.subr.bf16.mxu1 %v1357_v0 }
  0x20   :  { %1203 = vmatpush3.bf16.msra.mxu0 %v1202_v45  ;;  %v759_v45 = vld [vmem:[%s1815_s1 + $0x1f8] sm:$0xff] }
  0x21   :  { %1228 = vmatprep.subr.bf16.mxu0 %v1357_v0  ;;  %v1274_v46 = vpack.c.bf16 %v759_v45, %v758_v44  ;;  %v799_v44 = vld [vmem:[%s1815_s1 + $0x308] sm:$0xff] }
  0x22   :  { %1227 = vmatpush3.bf16.msra.mxu1 %v1226_v50 }
  0x23   :  { %968 = vmatmul.mubr.f32.vlgmr.msra.gmra.mrb[0].mxu0 %v14_v47  ;;  %1252 = vmatprep.subr.bf16.mxu1 %v1357_v0  ;;  %v762_v47 = vld [vmem:[%s1815_s1 + $0x200] sm:$0xff] }
  0x24   :  { %1037 = vmatprep.mubr.msk.f32.mxu0 %vm1358_vm0, %v1359_v4  ;;  %1230 = vmatpush3.bf16.msra.mxu0 %v1229_v54  ;;  %v1277_v50 = vpack.c.bf16 %v763_v48, %v762_v47  ;;  %v767_v54 = vld [vmem:[%s1815_s1 + $0x228] sm:$0xff]  ;;  %v802_v48 = vld [vmem:[%s1815_s1 + $0x320] sm:$0xff] }
  0x25   :  { %1231 = vmatprep.subr.bf16.mxu0 %v1357_v0  ;;  %v1283_v55 = vpack.c.bf16 %v767_v54, %v766_v53  ;;  %v806_v54 = vld [vmem:[%s1815_s1 + $0x340] sm:$0xff] }
  0x28   :  { %1233 = vmatpush3.bf16.msra.mxu0 %v1232_v56  ;;  %v768_v56 = vld [vmem:[%s1815_s1 + $0x230] sm:$0xff] }
  0x29   :  { %1234 = vmatprep.subr.bf16.mxu0 %v1357_v0  ;;  %v1286_v58 = vpack.c.bf16 %v769_v57, %v768_v56  ;;  %v808_v57 = vld [vmem:[%s1815_s1 + $0x350] sm:$0xff] }
  0x2c   :  { %1236 = vmatpush3.bf16.msra.mxu0 %v1235_v59  ;;  %v770_v59 = vld [vmem:[%s1815_s1 + $0x240] sm:$0xff] }
  0x2d   :  { %1237 = vmatprep.subr.bf16.mxu0 %v1357_v0  ;;  %v1289_v61 = vpack.c.bf16 %v771_v60, %v770_v59  ;;  %v810_v60 = vld [vmem:[%s1815_s1 + $0x360] sm:$0xff] }
  0x30   :  { %1239 = vmatpush3.bf16.msra.mxu0 %v1238_v62  ;;  %v772_v62 = vld [vmem:[%s1815_s1 + $0x250] sm:$0xff] }
  0x31   :  { %1240 = vmatprep.subr.bf16.mxu0 %v1357_v0  ;;  %v1292_v1 = vpack.c.bf16 %v773_v63, %v772_v62  ;;  %v779_v63 = vld [vmem:[%s1817_s2 + $0x4] ss:$0 sm:$0xff] }
  0x34   :  { %1242 = vmatpush3.bf16.msra.mxu0 %v1241_v2  ;;  %v774_v2 = vld [vmem:[%s1815_s1 + $0x260] sm:$0xff] }
  0x35   :  { %1243 = vmatprep.subr.bf16.mxu0 %v1357_v0  ;;  %v1295_v5 = vpack.c.bf16 %v775_v3, %v774_v2 }
  0x38   :  { %1245 = vmatpush3.bf16.msra.mxu0 %v1244_v6  ;;  %v743_v6 = vld [vmem:[%s1817_s2 + $0x2] ss:$0 sm:$0xff] }
  0x39   :  { %1246 = vmatprep.subr.bf16.mxu0 %v1357_v0 }
  0x3c   :  { %1248 = vmatpush3.bf16.msra.mxu0 %v1247_v9 }
  0x3d   :  { %1249 = vmatprep.subr.bf16.mxu0 %v1357_v0 }
  0x40   :  { %1251 = vmatpush3.bf16.msra.mxu0 %v1250_v17 }
  0x41   :  { %1276 = vmatprep.subr.bf16.mxu0 %v1357_v0 }
  0xf6   :  { %v104_v11 = vpop.f32.mrb[0].mxu0 }
  0xf7   :  { %v105_v12 = vadd.f32 %v707_v10, %v104_v11  ;;  %v969_v13 = vpop.f32.mrb[1].mxu0  ;;  %v776_v11 = vld [vmem:[%s1815_s1 + $0x270] sm:$0xff] }
  0xf9   :  { %v108_v14 = vmax.f32 %v105_v12, 0.0  ;;  %v777_v12 = vld [vmem:[%s1815_s1 + $0x278] sm:$0xff] }
  0xfa   :  { %v1298_v13 = vpack.c.bf16 %v777_v12, %v776_v11 }
  0xfb   :  { %1003 = vmatmul.mubr.f32.vlgmr.msra.gmra.mrb[0].mxu1 %v108_v14  ;;  %v780_v14 = vld [vmem:[%s1815_s1 + $0x280] sm:$0xff] }
  0xfc   :  { %1072 = vmatprep.mubr.msk.f32.mxu1 %vm1358_vm0, %v1359_v4  ;;  %1254 = vmatpush3.bf16.msra.mxu1 %v1253_v21  ;;  %v1301_v17 = vpack.c.bf16 %v781_v15, %v780_v14  ;;  %v785_v21 = vld [vmem:[%s1815_s1 + $0x2a8] sm:$0xff]  ;;  %v815_v15 = vld [vmem:[%s1817_s2 + $0x6] ss:$0 sm:$0xff] }
  0xfd   :  { %1255 = vmatprep.subr.bf16.mxu1 %v1357_v0  ;;  %v1307_v22 = vpack.c.bf16 %v785_v21, %v784_v20 }
 0x100   :  { %1257 = vmatpush3.bf16.msra.mxu1 %v1256_v23  ;;  %v786_v23 = vld [vmem:[%s1815_s1 + $0x2b0] sm:$0xff] }
 0x101   :  { %1258 = vmatprep.subr.bf16.mxu1 %v1357_v0  ;;  %v1310_v25 = vpack.c.bf16 %v787_v24, %v786_v23 }
 0x104   :  { %1260 = vmatpush3.bf16.msra.mxu1 %v1259_v26  ;;  %v788_v26 = vld [vmem:[%s1815_s1 + $0x2c0] sm:$0xff] }
 0x105   :  { %1261 = vmatprep.subr.bf16.mxu1 %v1357_v0  ;;  %v1313_v28 = vpack.c.bf16 %v789_v27, %v788_v26 }
 0x108   :  { %1263 = vmatpush3.bf16.msra.mxu1 %v1262_v29  ;;  %v790_v29 = vld [vmem:[%s1815_s1 + $0x2d0] sm:$0xff] }
 0x109   :  { %1264 = vmatprep.subr.bf16.mxu1 %v1357_v0  ;;  %v1316_v31 = vpack.c.bf16 %v791_v30, %v790_v29 }
 0x10c   :  { %1266 = vmatpush3.bf16.msra.mxu1 %v1265_v32  ;;  %v792_v32 = vld [vmem:[%s1815_s1 + $0x2e0] sm:$0xff] }
 0x10d   :  { %1267 = vmatprep.subr.bf16.mxu1 %v1357_v0  ;;  %v1319_v34 = vpack.c.bf16 %v793_v33, %v792_v32 }
 0x110   :  { %1269 = vmatpush3.bf16.msra.mxu1 %v1268_v35  ;;  %v761_v35 = vld [vmem:[%s1817_s2 + $0x3] ss:$0 sm:$0xff] }
 0x111   :  { %1270 = vmatprep.subr.bf16.mxu1 %v1357_v0 }
 0x114   :  { %1272 = vmatpush3.bf16.msra.mxu1 %v1271_v38 }
 0x115   :  { %1273 = vmatprep.subr.bf16.mxu1 %v1357_v0 }
 0x118   :  { %1275 = vmatpush3.bf16.msra.mxu1 %v1274_v46  ;;  %v801_v46 = vld [vmem:[%s1815_s1 + $0x318] sm:$0xff] }
 0x119   :  { %1300 = vmatprep.subr.bf16.mxu1 %v1357_v0 }
 0x1ce   :  { %v200_v40 = vpop.f32.mrb[0].mxu1 }
 0x1cf   :  { %v201_v41 = vadd.f32 %v725_v39, %v200_v40  ;;  %v1004_v42 = vpop.f32.mrb[1].mxu1  ;;  %v794_v40 = vld [vmem:[%s1815_s1 + $0x2f0] sm:$0xff] }
 0x1d1   :  { %v204_v43 = vmax.f32 %v201_v41, 0.0  ;;  %v795_v41 = vld [vmem:[%s1815_s1 + $0x2f8] sm:$0xff] }
 0x1d2   :  { %v1322_v42 = vpack.c.bf16 %v795_v41, %v794_v40 }
 0x1d3   :  { %1038 = vmatmul.mubr.f32.vlgmr.msra.gmra.mrb[2].mxu0 %v204_v43  ;;  %v798_v43 = vld [vmem:[%s1815_s1 + $0x300] sm:$0xff] }
 0x1d4   :  { %1107 = vmatprep.mubr.msk.f32.mxu0 %vm1358_vm0, %v1359_v4  ;;  %1278 = vmatpush3.bf16.msra.mxu0 %v1277_v50  ;;  %v1325_v45 = vpack.c.bf16 %v799_v44, %v798_v43  ;;  %v1331_v50 = vpack.c.bf16 %v803_v49, %v802_v48 }
 0x1d5   :  { %1279 = vmatprep.subr.bf16.mxu0 %v1357_v0 }
 0x1d8   :  { %1281 = vmatpush3.bf16.msra.mxu0 %v1280_v52  ;;  %v805_v52 = vld [vmem:[%s1815_s1 + $0x338] sm:$0xff] }
 0x1d9   :  { %1282 = vmatprep.subr.bf16.mxu0 %v1357_v0  ;;  %v1334_v53 = vpack.c.bf16 %v805_v52, %v804_v51 }
 0x1dc   :  { %1284 = vmatpush3.bf16.msra.mxu0 %v1283_v55  ;;  %v807_v55 = vld [vmem:[%s1815_s1 + $0x348] sm:$0xff] }
 0x1dd   :  { %1285 = vmatprep.subr.bf16.mxu0 %v1357_v0  ;;  %v1337_v56 = vpack.c.bf16 %v807_v55, %v806_v54 }
 0x1e0   :  { %1287 = vmatpush3.bf16.msra.mxu0 %v1286_v58  ;;  %v809_v58 = vld [vmem:[%s1815_s1 + $0x358] sm:$0xff] }
 0x1e1   :  { %1288 = vmatprep.subr.bf16.mxu0 %v1357_v0  ;;  %v1340_v59 = vpack.c.bf16 %v809_v58, %v808_v57 }
 0x1e4   :  { %1290 = vmatpush3.bf16.msra.mxu0 %v1289_v61  ;;  %v811_v61 = vld [vmem:[%s1815_s1 + $0x368] sm:$0xff] }
 0x1e5   :  { %1291 = vmatprep.subr.bf16.mxu0 %v1357_v0  ;;  %v1343_v62 = vpack.c.bf16 %v811_v61, %v810_v60 }
 0x1e8   :  { %1293 = vmatpush3.bf16.msra.mxu0 %v1292_v1 }
 0x1e9   :  { %1294 = vmatprep.subr.bf16.mxu0 %v1357_v0 }
 0x1ec   :  { %1296 = vmatpush3.bf16.msra.mxu0 %v1295_v5 }
 0x1ed   :  { %1297 = vmatprep.subr.bf16.mxu0 %v1357_v0 }
 0x1f0   :  { %1299 = vmatpush3.bf16.msra.mxu0 %v1298_v13  ;;  %v684_v13 = vlaneseq }
 0x1f1   :  { %1324 = vmatprep.subr.bf16.mxu0 %v1357_v0 }
 0x1f2   :  { %v685_v14 = vand.u32 127, %v684_v13 }
 0x1f4   :  { %vm686_vm1 = vcmp.lt.s32.totalorder %v685_v14, 26  ;;  %vm687_vm2 = vcmp.eq.s32.totalorder %v685_v14, 26 }
 0x2a6   :  { %v296_v7 = vpop.f32.mrb[2].mxu0 }
 0x2a7   :  { %v297_v8 = vadd.f32 %v743_v6, %v296_v7  ;;  %v1039_v9 = vpop.f32.mrb[3].mxu0  ;;  %v812_v6 = vld [vmem:[%s1815_s1 + $0x370] sm:$0xff]  ;;  %v813_v7 = vld [vmem:[%s1815_s1 + $0x378] sm:$0xff] }
 0x2a9   :  { %v300_v10 = vmax.f32 %v297_v8, 0.0  ;;  %v1346_v8 = vpack.c.bf16 %v813_v7, %v812_v6 }
 0x2ab   :  { %1073 = vmatmul.mubr.f32.vlgmr.msra.gmra.mrb[2].mxu1 %v300_v10 }
 0x2ac   :  { %1142 = vmatprep.mubr.msk.f32.mxu1 %vm1358_vm0, %v1359_v4  ;;  %1302 = vmatpush3.bf16.msra.mxu1 %v1301_v17 }
 0x2ad   :  { %1303 = vmatprep.subr.bf16.mxu1 %v1357_v0 }
 0x2b0   :  { %1305 = vmatpush3.bf16.msra.mxu1 %v1304_v19 }
 0x2b1   :  { %1306 = vmatprep.subr.bf16.mxu1 %v1357_v0 }
 0x2b4   :  { %1308 = vmatpush3.bf16.msra.mxu1 %v1307_v22 }
 0x2b5   :  { %1309 = vmatprep.subr.bf16.mxu1 %v1357_v0 }
 0x2b8   :  { %1311 = vmatpush3.bf16.msra.mxu1 %v1310_v25 }
 0x2b9   :  { %1312 = vmatprep.subr.bf16.mxu1 %v1357_v0 }
 0x2bc   :  { %1314 = vmatpush3.bf16.msra.mxu1 %v1313_v28 }
 0x2bd   :  { %1315 = vmatprep.subr.bf16.mxu1 %v1357_v0 }
 0x2c0   :  { %1317 = vmatpush3.bf16.msra.mxu1 %v1316_v31 }
 0x2c1   :  { %1318 = vmatprep.subr.bf16.mxu1 %v1357_v0 }
 0x2c4   :  { %1320 = vmatpush3.bf16.msra.mxu1 %v1319_v34 }
 0x2c5   :  { %1321 = vmatprep.subr.bf16.mxu1 %v1357_v0 }
 0x2c8   :  { %1323 = vmatpush3.bf16.msra.mxu1 %v1322_v42 }
 0x37e   :  { %v392_v36 = vpop.f32.mrb[2].mxu1 }
 0x37f   :  { %v393_v37 = vadd.f32 %v761_v35, %v392_v36  ;;  %v1074_v38 = vpop.f32.mrb[3].mxu1 }
 0x381   :  { %v396_v39 = vmax.f32 %v393_v37, 0.0 }
 0x383   :  { %1108 = vmatmul.mubr.f32.vlgmr.msra.gmra.mrb[4].mxu0 %v396_v39 }
 0x384   :  { %1177 = vmatprep.mubr.msk.f32.mxu0 %vm1358_vm0, %v1359_v4  ;;  %v800_v4 = vld [vmem:[%s1815_s1 + $0x310] sm:$0xff]  ;;  %1326 = vmatpush3.bf16.msra.mxu0 %v1325_v45 }
 0x385   :  { %v1328_v47 = vpack.c.bf16 %v801_v46, %v800_v4  ;;  %1327 = vmatprep.subr.bf16.mxu0 %v1357_v0 }
 0x388   :  { %1329 = vmatpush3.bf16.msra.mxu0 %v1328_v47 }
 0x389   :  { %1330 = vmatprep.subr.bf16.mxu0 %v1357_v0 }
 0x38c   :  { %1332 = vmatpush3.bf16.msra.mxu0 %v1331_v50 }
 0x38d   :  { %1333 = vmatprep.subr.bf16.mxu0 %v1357_v0 }
 0x390   :  { %1335 = vmatpush3.bf16.msra.mxu0 %v1334_v53 }
 0x391   :  { %1336 = vmatprep.subr.bf16.mxu0 %v1357_v0 }
 0x394   :  { %1338 = vmatpush3.bf16.msra.mxu0 %v1337_v56 }
 0x395   :  { %1339 = vmatprep.subr.bf16.mxu0 %v1357_v0 }
 0x398   :  { %1341 = vmatpush3.bf16.msra.mxu0 %v1340_v59 }
 0x399   :  { %1342 = vmatprep.subr.bf16.mxu0 %v1357_v0 }
 0x39c   :  { %1344 = vmatpush3.bf16.msra.mxu0 %v1343_v62 }
 0x39d   :  { %1345 = vmatprep.subr.bf16.mxu0 %v1357_v0  ;;  %v797_v0 = vld [vmem:[%s1817_s2 + $0x5] ss:$0 sm:$0xff] }
 0x3a0   :  { %1347 = vmatpush3.bf16.msra.mxu0 %v1346_v8 }
 0x456   :  { %v488_v1 = vpop.f32.mrb[4].mxu0 }
 0x457   :  { %v489_v2 = vadd.f32 %v779_v63, %v488_v1  ;;  %v1109_v3 = vpop.f32.mrb[5].mxu0 }
 0x459   :  { %v492_v5 = vmax.f32 %v489_v2, 0.0 }
 0x45b   :  { %1143 = vmatmul.mubr.f32.vlgmr.msra.gmra.mrb[4].mxu1 %v492_v5 }
 0x52e   :  { %v584_v9 = vpop.f32.mrb[4].mxu1 }
 0x52f   :  { %v585_v10 = vadd.f32 %v797_v0, %v584_v9  ;;  %v1144_v11 = vpop.f32.mrb[5].mxu1 }
 0x531   :  { %v588_v12 = vmax.f32 %v585_v10, 0.0 }
 0x533   :  { %1178 = vmatmul.mubr.f32.vlgmr.msra.gmra.mrb[6].mxu0 %v588_v12 }
 0x606   :  { %v680_v16 = vpop.f32.mrb[6].mxu0 }
 0x607   :  { %v681_v17 = vadd.f32 %v815_v15, %v680_v16  ;;  %v1179_v18 = vpop.f32.mrb[7].mxu0 }
 0x609   :  { %1351 = vtanh.f32 %v681_v17  ;;  %v688_v19 = vsel %vm686_vm1, %v681_v17, -1e+30 }
 0x60a   :  { %689 = vmax.xlane.f32.xlu0 %v688_v19 }
 0x613   :  { %v1352_v20 = vpop.eup %1351 }
 0x614   :  { %v700_v21 = vsel %vm687_vm2, %v1352_v20, 0.0 }
 0x697   :  { %v690_v22 = vpop.xlane.xlu0 %689 }
 0x698   :  { %v691_v23 = vsub.f32 %v688_v19, %v690_v22 }
 0x69a   :  { %v692_v24 = vmul.f32 1.442695, %v691_v23 }
 0x69c   :  { %1353 = vpow2.f32 %v692_v24 }
 0x6a6   :  { %v1354_v25 = vpop.eup %1353 }
 0x6a7   :  { %694 = vadd.xlane.f32.xlu0 %v1354_v25 }
 0x734   :  { %v695_v26 = vpop.xlane.xlu0 %694 }
 0x735   :  { %1355 = vlog2.f32 %v695_v26 }
 0x73f   :  { %v1356_v27 = vpop.eup %1355 }
 0x740   :  { %v697_v28 = vmul.f32 0.6931472, %v1356_v27 }
 0x742   :  { %v698_v29 = vsub.f32 %v691_v23, %v697_v28 }
 0x744   :  { %v701_v30 = vsel %vm686_vm1, %v698_v29, %v700_v21 }
 0x745   :  { %702 = vst [vmem:[%s1818_s3] sm:$0xff] %v701_v30 }

</bundles_post_ra>
